<compile_context>
chip_gen: v6e
topology: v6e:2x2x1
jax: 0.10.0
libtpu: 0.0.40
codegen_flags: <defaults>
</compile_context>

<pallas_src>
import jax
import jax.numpy as jnp
from jax.experimental import pallas as pl
from jax.experimental.pallas import tpu as pltpu


_LANE = 128


def _round_up(a, m):
    return (a + m - 1) // m * m


def _vmem_limit_bytes():
    """Generation-aware VMEM limit: leave headroom below physical capacity."""
    cap = 128 << 20
    try:
        cap = int(pltpu.get_tpu_info().vmem_capacity_bytes)
        if cap <= 0:
            cap = 128 << 20
    except Exception:           # no TPU / interpret mode: assume 128 MiB class
        cap = 128 << 20
    # ~16 MiB headroom for compiler scratch / double buffers; never ask > 112 MiB.
    return int(min(max(cap - (16 << 20), 32 << 20), 112 << 20))


def _divisor_tile(n, cap, granule=_LANE):
    """Largest tile <= cap that is a multiple of `granule` and divides n exactly.
    Falls back to n (full extent) — always a legal block shape."""
    if n <= cap:
        return n
    t = (cap // granule) * granule
    while t >= granule:
        if n % t == 0:
            return t
        t -= granule
    return n


def _fused_shared_fits(nf, seq_out, tm, out_itemsize, vmem_limit):
    """Conservative VMEM estimate for the fused resident-weight shared head."""
    weight_bytes = 2 * (3 * nf * nf + nf * seq_out)            # bf16 weights
    bias_bytes = 4 * (3 * nf + seq_out)                        # fp32 biases
    act_bytes = 2 * tm * nf * 4 + 2 * tm * seq_out * out_itemsize   # dbl-buffered x / out
    # factor 2 on residents: Pallas may still double-buffer constant-index blocks.
    return 2 * (weight_bytes + bias_bytes) + act_bytes + (4 << 20) <= vmem_limit


# ----------------------------------------------------------------------------
# Shared head (individual=False), fused path:
#   z = flatten(x); z = relu(z@W1+b1)+z; z = relu(z@W2+b2)+z;
#   z = relu(z@W3+b3)+z; out = z@W4+b4
# ----------------------------------------------------------------------------
def _shared_head_kernel(x_ref, w1_ref, b1_ref, w2_ref, b2_ref,
                        w3_ref, b3_ref, w4_ref, b4_ref, o_ref):
    # x_ref: (tm, nf) fp32; w*: bf16 [in, out]; b*: fp32 (1, out).
    z = x_ref[...].astype(jnp.float32)

    def res_block(z, w_ref, b_ref):
        y = jnp.dot(z.astype(jnp.bfloat16), w_ref[...],
                    preferred_element_type=jnp.float32) + b_ref[...]
        return jnp.maximum(y, 0.0) + z          # ReLU + residual in fp32

    z = res_block(z, w1_ref, b1_ref)
    z = res_block(z, w2_ref, b2_ref)
    z = res_block(z, w3_ref, b3_ref)
    out = jnp.dot(z.astype(jnp.bfloat16), w4_ref[...],
                  preferred_element_type=jnp.float32) + b4_ref[...]
    o_ref[...] = out.astype(o_ref.dtype)


def _shared_head_fused(x2, prep, out_dtype, tm, vmem_limit):
    rows, nf = x2.shape
    seq_pad = prep["seq_pad"]
    grid_m = pl.cdiv(rows, tm)

    def resident(shape):
        return pl.BlockSpec(shape, lambda *_: (0,) * len(shape))

    return pl.pallas_call(
        _shared_head_kernel,
        out_shape=jax.ShapeDtypeStruct((rows, seq_pad), out_dtype),
        grid_spec=pltpu.PrefetchScalarGridSpec(
            num_scalar_prefetch=0,
            grid=(grid_m,),
            in_specs=[
                pl.BlockSpec((tm, nf), lambda i: (i, 0)),      # x rows
                resident((nf, nf)), resident((1, nf)),         # W1, b1
                resident((nf, nf)), resident((1, nf)),         # W2, b2
                resident((nf, nf)), resident((1, nf)),         # W3, b3
                resident((nf, seq_pad)), resident((1, seq_pad)),  # W4, b4 (lane padded)
            ],
            out_specs=pl.BlockSpec((tm, seq_pad), lambda i: (i, 0)),
        ),
        compiler_params=pltpu.CompilerParams(
            dimension_semantics=("parallel",),
            vmem_limit_bytes=vmem_limit),
    )(x2, prep["w1"], prep["b1"], prep["w2"], prep["b2"],
      prep["w3"], prep["b3"], prep["w4"], prep["b4"])


# ----------------------------------------------------------------------------
# Shared head, K-tiled per-layer path (large nf, e.g. v7x 64 MiB VMEM).
# ----------------------------------------------------------------------------
def _tiled_linear_kernel(x_ref, w_ref, b_ref, o_ref, acc_ref):
    k = pl.program_id(2)

    @pl.when(k == 0)
    def _():
        acc_ref[...] = jnp.zeros_like(acc_ref)

    acc_ref[...] += jnp.dot(x_ref[...].astype(jnp.bfloat16), w_ref[...],
                            preferred_element_type=jnp.float32)

    @pl.when(k == pl.num_programs(2) - 1)
    def _():
        o_ref[...] = (acc_ref[...] + b_ref[...]).astype(o_ref.dtype)


def _tiled_linear_residual_kernel(x_ref, r_ref, w_ref, b_ref, o_ref, acc_ref):
    k = pl.program_id(2)

    @pl.when(k == 0)
    def _():
        acc_ref[...] = jnp.zeros_like(acc_ref)

    acc_ref[...] += jnp.dot(x_ref[...].astype(jnp.bfloat16), w_ref[...],
                            preferred_element_type=jnp.float32)

    @pl.when(k == pl.num_programs(2) - 1)
    def _():
        y = jnp.maximum(acc_ref[...] + b_ref[...], 0.0) + r_ref[...]
        o_ref[...] = y.astype(o_ref.dtype)


def _tiled_linear(x2, w, b, *, residual, out_dtype, vmem_limit,
                  tm_max=128, tn_max=512, tk_max=512):
    """out = relu(x2 @ w + b) + x2  (residual=True, requires square w)
       or    x2 @ w + b            (residual=False)."""
    rows, K = x2.shape
    N = w.shape[1]
    tm = rows if rows <= tm_max else tm_max
    tn = _divisor_tile(N, tn_max)
    tk = _divisor_tile(K, tk_max)
    grid = (pl.cdiv(rows, tm), N // tn, K // tk)

    in_specs = [pl.BlockSpec((tm, tk), lambda i, j, k: (i, k))]
    operands = [x2]
    if residual:
        kernel = _tiled_linear_residual_kernel
        in_specs.append(pl.BlockSpec((tm, tn), lambda i, j, k: (i, j)))
        operands.append(x2)                      # residual = layer input
    else:
        kernel = _tiled_linear_kernel
    in_specs += [pl.BlockSpec((tk, tn), lambda i, j, k: (k, j)),
                 pl.BlockSpec((1, tn), lambda i, j, k: (0, j))]
    operands += [w, b]

    return pl.pallas_call(
        kernel,
        out_shape=jax.ShapeDtypeStruct((rows, N), out_dtype),
        grid_spec=pltpu.PrefetchScalarGridSpec(
            num_scalar_prefetch=0,
            grid=grid,
            in_specs=in_specs,
            out_specs=pl.BlockSpec((tm, tn), lambda i, j, k: (i, j)),
            scratch_shapes=[pltpu.VMEM((tm, tn), jnp.float32)]),
        compiler_params=pltpu.CompilerParams(
            dimension_semantics=("parallel", "parallel", "arbitrary"),
            vmem_limit_bytes=vmem_limit),
    )(*operands)


def _shared_head_tiled(x2, prep, out_dtype, vmem_limit, *, tm_max, tn_max, tk_max):
    kw = dict(vmem_limit=vmem_limit, tm_max=tm_max, tn_max=tn_max, tk_max=tk_max)
    z = _tiled_linear(x2, prep["w1"], prep["b1"], residual=True,
                      out_dtype=jnp.float32, **kw)
    z = _tiled_linear(z, prep["w2"], prep["b2"], residual=True,
                      out_dtype=jnp.float32, **kw)
    z = _tiled_linear(z, prep["w3"], prep["b3"], residual=True,
                      out_dtype=jnp.float32, **kw)
    return _tiled_linear(z, prep["w4"], prep["b4"], residual=False,
                         out_dtype=out_dtype, **kw)


def flatten_head_shared(x, prep, *, tm_max=None, tn_max=512, tk_max=512,
                        force_tiled=False):
    """x: [B, n_vars, d_model, patch_num] -> [B, n_vars, seq_len] (individual=False)."""
    B, n_vars, d_model, patch_num = x.shape
    nf = d_model * patch_num
    assert nf == prep["nf"]
    seq_len, seq_pad = prep["seq_len"], prep["seq_pad"]
    rows = B * n_vars

    # flatten(start_dim=-2) + merge batch dims: free, contiguous reshape, no cast.
    x2 = x.reshape(rows, nf)

    vmem_limit = _vmem_limit_bytes()
    if tm_max is None:
        tm_max = 256 if vmem_limit >= (96 << 20) else 128   # v5e/v6e vs v7x-class
    tm = rows if rows <= tm_max else tm_max
    out_itemsize = jnp.dtype(x.dtype).itemsize

    if force_tiled or not _fused_shared_fits(nf, seq_pad, tm, out_itemsize, vmem_limit):
        out2 = _shared_head_tiled(x2, prep, x.dtype, vmem_limit,
                                  tm_max=tm_max, tn_max=tn_max, tk_max=tk_max)
    else:
        out2 = _shared_head_fused(x2, prep, x.dtype, tm, vmem_limit)

    out = out2.reshape(B, n_vars, seq_pad)
    if seq_pad != seq_len:
        out = out[:, :, :seq_len]
    return out


# ----------------------------------------------------------------------------
# Individual head: per-variable Linear(nf -> seq_len); n_vars on the grid.
# ----------------------------------------------------------------------------
def _indiv_head_kernel(x_ref, w_ref, b_ref, o_ref):
    # x_ref: (bt, nf_pad) fp32; w_ref: (nf_pad, seq_pad) bf16; b_ref: (1, seq_pad) fp32.
    y = jnp.dot(x_ref[...].astype(jnp.bfloat16), w_ref[...],
                preferred_element_type=jnp.float32) + b_ref[...]
    o_ref[...] = y.astype(o_ref.dtype)


def flatten_head_individual(x, prep, *, bt_max=128):
    """x: [B, n_vars, d_model, patch_num] -> [B, n_vars, seq_len] (individual=True)."""
    B, n_vars, d_model, patch_num = x.shape
    nf = d_model * patch_num
    assert nf == prep["nf"] and n_vars == prep["n_vars"]
    nf_pad, seq_len, seq_pad = prep["nf_pad"], prep["seq_len"], prep["seq_pad"]

    x3 = x.reshape(B, n_vars, nf)
    if nf_pad != nf:
        # Only hit when nf is not lane (128) aligned; keeps per-variable column
        # slices lane-aligned inside the kernel (weights are zero-padded to match).
        x3 = jnp.pad(x3, ((0, 0), (0, 0), (0, nf_pad - nf)))
    x2 = x3.reshape(B, n_vars * nf_pad)

    bt = B if B <= bt_max else bt_max
    grid_b = pl.cdiv(B, bt)
    vmem_limit = _vmem_limit_bytes()

    out2 = pl.pallas_call(
        _indiv_head_kernel,
        out_shape=jax.ShapeDtypeStruct((B, n_vars * seq_pad), x.dtype),
        grid_spec=pltpu.PrefetchScalarGridSpec(
            num_scalar_prefetch=0,
            grid=(n_vars, grid_b),            # v outer: each weight is DMA'd once
            in_specs=[
                pl.BlockSpec((bt, nf_pad), lambda v, i: (i, v)),
                pl.BlockSpec((None, nf_pad, seq_pad), lambda v, i: (v, 0, 0)),
                pl.BlockSpec((None, 1, seq_pad), lambda v, i: (v, 0, 0)),
            ],
            out_specs=pl.BlockSpec((bt, seq_pad), lambda v, i: (i, v)),
        ),
        compiler_params=pltpu.CompilerParams(
            dimension_semantics=("parallel", "parallel"),
            vmem_limit_bytes=vmem_limit),
    )(x2, prep["w"], prep["b"])

    out = out2.reshape(B, n_vars, seq_pad)
    if seq_pad != seq_len:
        out = out[:, :, :seq_len]
    return out


# ----------------------------------------------------------------------------
# One-time parameter preparation (bf16 cast + lane padding).  In production this
# is done once at load time / cached, not per forward call.
# ----------------------------------------------------------------------------
def prepare_shared_params(params):
    w1, b1, w2, b2, w3, b3, w4, b4 = params
    nf = w1.shape[0]
    seq_len = w4.shape[1]
    # Lane-pad the output dim only when it is small; for large seq_len use the
    # true extent (full-extent last-dim blocks, masked tail stores in-kernel).
    seq_pad = _round_up(seq_len, _LANE) if seq_len < 256 else seq_len
    return dict(
        nf=nf, seq_len=seq_len, seq_pad=seq_pad,
        w1=w1.astype(jnp.bfloat16), b1=jnp.reshape(b1, (1, nf)).astype(jnp.float32),
        w2=w2.astype(jnp.bfloat16), b2=jnp.reshape(b2, (1, nf)).astype(jnp.float32),
        w3=w3.astype(jnp.bfloat16), b3=jnp.reshape(b3, (1, nf)).astype(jnp.float32),
        w4=jnp.pad(w4.astype(jnp.bfloat16), ((0, 0), (0, seq_pad - seq_len))),
        b4=jnp.pad(jnp.reshape(b4, (1, seq_len)).astype(jnp.float32),
                   ((0, 0), (0, seq_pad - seq_len))),
    )


def prepare_individual_params(params):
    ws, bs = params                      # [n_vars, nf, seq_len], [n_vars, seq_len]
    n_vars, nf, seq_len = ws.shape
    nf_pad = _round_up(nf, _LANE)
    seq_pad = _round_up(seq_len, _LANE)
    wp = jnp.pad(ws.astype(jnp.bfloat16),
                 ((0, 0), (0, nf_pad - nf), (0, seq_pad - seq_len)))
    bp = jnp.pad(bs.astype(jnp.float32),
                 ((0, 0), (0, seq_pad - seq_len))).reshape(n_vars, 1, seq_pad)
    return dict(n_vars=n_vars, nf=nf, nf_pad=nf_pad,
                seq_len=seq_len, seq_pad=seq_pad, w=wp, b=bp)


# ----------------------------------------------------------------------------
# Deterministic parameter init (PyTorch nn.Linear-style uniform bounds).
# Weights are stored already transposed as [in, out] so kernels do x @ W.
# ----------------------------------------------------------------------------
def _linear_params(key, fan_in, fan_out):
    kw, kb = jax.random.split(key)
    bound = 1.0 / jnp.sqrt(fan_in)
    w = jax.random.uniform(kw, (fan_in, fan_out), jnp.float32, -bound, bound)
    b = jax.random.uniform(kb, (1, fan_out), jnp.float32, -bound, bound)
    return w, b


def init_shared_params(key, nf, seq_len):
    ks = jax.random.split(key, 4)
    w1, b1 = _linear_params(ks[0], nf, nf)
    w2, b2 = _linear_params(ks[1], nf, nf)
    w3, b3 = _linear_params(ks[2], nf, nf)
    w4, b4 = _linear_params(ks[3], nf, seq_len)
    return (w1, b1, w2, b2, w3, b3, w4, b4)


def init_individual_params(key, n_vars, nf, seq_len):
    ks = jax.random.split(key, n_vars)
    ws, bs = [], []
    for i in range(n_vars):
        w, b = _linear_params(ks[i], nf, seq_len)
        ws.append(w)
        bs.append(b[0])
    return jnp.stack(ws, 0), jnp.stack(bs, 0)     # [n_vars, nf, seq], [n_vars, seq]


# ----------------------------------------------------------------------------
# References.  The bf16-mimic versions round the matmul operands to bf16 but do
# the dot in fp32 (matches bf16-operand / fp32-accumulate MXU numerics and avoids
# BF16xBF16=F32 dots, which the CPU/interpret backend cannot execute).
# ----------------------------------------------------------------------------
def _bf16_round(a):
    return a.astype(jnp.bfloat16).astype(jnp.float32)


def ref_shared(x, params):
    B, n_vars, d_model, patch_num = x.shape
    w1, b1, w2, b2, w3, b3, w4, b4 = params
    z = x.reshape(B, n_vars, d_model * patch_num)
    z = jax.nn.relu(z @ w1 + b1) + z
    z = jax.nn.relu(z @ w2 + b2) + z
    z = jax.nn.relu(z @ w3 + b3) + z
    return z @ w4 + b4


def ref_shared_bf16(x, params):
    B, n_vars, d_model, patch_num = x.shape
    nf = d_model * patch_num
    w1, b1, w2, b2, w3, b3, w4, b4 = params
    z = x.reshape(B * n_vars, nf)              # fp32, like the kernel

    def blk(z, w, b):
        y = jnp.dot(_bf16_round(z), _bf16_round(w)) + b
        return jnp.maximum(y, 0.0) + z

    z = blk(z, w1, b1)
    z = blk(z, w2, b2)
    z = blk(z, w3, b3)
    out = jnp.dot(_bf16_round(z), _bf16_round(w4)) + b4
    return out.reshape(B, n_vars, -1)


def ref_individual(x, params):
    B, n_vars, d_model, patch_num = x.shape
    ws, bs = params
    z = x.reshape(B, n_vars, d_model * patch_num)
    return jnp.einsum("bvn,vns->bvs", z, ws) + bs[None, :, :]


def ref_individual_bf16(x, params):
    B, n_vars, d_model, patch_num = x.shape
    ws, bs = params
    z = x.reshape(B, n_vars, d_model * patch_num)
    y = jnp.einsum("bvn,vns->bvs", _bf16_round(z), _bf16_round(ws))
    return y + bs[None, :, :]


if __name__ == "__main__":
    # Small shapes consistent with the module: nf = d_model * patch_num.
    B, n_vars, d_model, patch_num, seq_len = 2, 4, 16, 16, 32
    nf = d_model * patch_num                 # 256

    key = jax.random.PRNGKey(0)
    kx, kps, kpi = jax.random.split(key, 3)
    x = jax.random.normal(kx, (B, n_vars, d_model, patch_num), jnp.float32)

    # individual = False (shared residual MLP head), fused resident-weight path.
    shared_params = init_shared_params(kps, nf, seq_len)
    shared_prep = prepare_shared_params(shared_params)
    out_s = jax.block_until_ready(flatten_head_shared(x, shared_prep))
    assert out_s.shape == (B, n_vars, seq_len)
    assert jnp.allclose(out_s, ref_shared_bf16(x, shared_params), atol=2e-2, rtol=2e-2)
    assert jnp.allclose(out_s, ref_shared(x, shared_params), atol=1e-1, rtol=1e-1)

    # Same head via the K-tiled per-layer path (used when the resident weights do
    # not fit VMEM, e.g. large nf on v7x); forced here with a 2-step K grid.
    out_t = jax.block_until_ready(
        flatten_head_shared(x, shared_prep, force_tiled=True, tk_max=128))
    assert out_t.shape == (B, n_vars, seq_len)
    assert jnp.allclose(out_t, ref_shared_bf16(x, shared_params), atol=2e-2, rtol=2e-2)

    # individual = True (per-variable Linear head), n_vars on the grid.
    indiv_params = init_individual_params(kpi, n_vars, nf, seq_len)
    indiv_prep = prepare_individual_params(indiv_params)
    out_i = jax.block_until_ready(flatten_head_individual(x, indiv_prep))
    assert out_i.shape == (B, n_vars, seq_len)
    assert jnp.allclose(out_i, ref_individual_bf16(x, indiv_params), atol=2e-2, rtol=2e-2)
    assert jnp.allclose(out_i, ref_individual(x, indiv_params), atol=5e-2, rtol=5e-2)

    print("KERNEL_OK")
</pallas_src>

<mosaic_0001>
module attributes {stable_mosaic.version = 11 : i64} {
  func.func @_shared_head_kernel(%arg0: i32, %arg1: memref<8x256xf32, #tpu.memory_space<vmem>>, %arg2: memref<256x256xbf16, #tpu.memory_space<vmem>>, %arg3: memref<1x256xf32, #tpu.memory_space<vmem>>, %arg4: memref<256x256xbf16, #tpu.memory_space<vmem>>, %arg5: memref<1x256xf32, #tpu.memory_space<vmem>>, %arg6: memref<256x256xbf16, #tpu.memory_space<vmem>>, %arg7: memref<1x256xf32, #tpu.memory_space<vmem>>, %arg8: memref<256x128xbf16, #tpu.memory_space<vmem>>, %arg9: memref<1x128xf32, #tpu.memory_space<vmem>>, %arg10: memref<8x128xf32, #tpu.memory_space<vmem>>) attributes {dimension_semantics = [#tpu.dimension_semantics<parallel>], iteration_bounds = array<i64: 1>, scalar_prefetch = 0 : i64, scratch_operands = 0 : i64, tpu.core_type = #tpu.core_type<tc>, window_params = [{transform_indices = @transform_0, window_bounds = array<i64: 8, 256>}, {pipeline_mode = #tpu.pipeline_mode<synchronous>, transform_indices = @transform_1, window_bounds = array<i64: 256, 256>}, {pipeline_mode = #tpu.pipeline_mode<synchronous>, transform_indices = @transform_2, window_bounds = array<i64: 1, 256>}, {pipeline_mode = #tpu.pipeline_mode<synchronous>, transform_indices = @transform_3, window_bounds = array<i64: 256, 256>}, {pipeline_mode = #tpu.pipeline_mode<synchronous>, transform_indices = @transform_4, window_bounds = array<i64: 1, 256>}, {pipeline_mode = #tpu.pipeline_mode<synchronous>, transform_indices = @transform_5, window_bounds = array<i64: 256, 256>}, {pipeline_mode = #tpu.pipeline_mode<synchronous>, transform_indices = @transform_6, window_bounds = array<i64: 1, 256>}, {pipeline_mode = #tpu.pipeline_mode<synchronous>, transform_indices = @transform_7, window_bounds = array<i64: 256, 128>}, {pipeline_mode = #tpu.pipeline_mode<synchronous>, transform_indices = @transform_8, window_bounds = array<i64: 1, 128>}, {transform_indices = @transform_9, window_bounds = array<i64: 8, 128>}]} {
    %c0 = arith.constant 0 : index
    %c0_0 = arith.constant 0 : index
    %0 = vector.load %arg1[%c0, %c0_0] : memref<8x256xf32, #tpu.memory_space<vmem>>, vector<8x256xf32>
    %1 = arith.truncf %0 : vector<8x256xf32> to vector<8x256xbf16>
    %c0_1 = arith.constant 0 : index
    %c0_2 = arith.constant 0 : index
    %2 = vector.load %arg2[%c0_1, %c0_2] : memref<256x256xbf16, #tpu.memory_space<vmem>>, vector<256x256xbf16>
    %cst = arith.constant dense<0.000000e+00> : vector<8x256xf32>
    %3 = tpu.matmul %1, %2, %cst {dimension_numbers = #tpu.dot_dimension_numbers<[1], [0], [0], [1], [0, 0, 1, 1], [], []>} : vector<8x256xbf16>, vector<256x256xbf16>, vector<8x256xf32> -> vector<8x256xf32>
    %c0_3 = arith.constant 0 : index
    %c0_4 = arith.constant 0 : index
    %4 = vector.load %arg3[%c0_3, %c0_4] : memref<1x256xf32, #tpu.memory_space<vmem>>, vector<1x256xf32>
    %5 = vector.broadcast %4 : vector<1x256xf32> to vector<8x256xf32>
    %6 = arith.addf %3, %5 : vector<8x256xf32>
    %cst_5 = arith.constant 0.000000e+00 : f32
    %7 = vector.broadcast %cst_5 : f32 to vector<8x256xf32>
    %8 = arith.maximumf %6, %7 : vector<8x256xf32>
    %9 = arith.addf %8, %0 : vector<8x256xf32>
    %10 = arith.truncf %9 : vector<8x256xf32> to vector<8x256xbf16>
    %c0_6 = arith.constant 0 : index
    %c0_7 = arith.constant 0 : index
    %11 = vector.load %arg4[%c0_6, %c0_7] : memref<256x256xbf16, #tpu.memory_space<vmem>>, vector<256x256xbf16>
    %cst_8 = arith.constant dense<0.000000e+00> : vector<8x256xf32>
    %12 = tpu.matmul %10, %11, %cst_8 {dimension_numbers = #tpu.dot_dimension_numbers<[1], [0], [0], [1], [0, 0, 1, 1], [], []>} : vector<8x256xbf16>, vector<256x256xbf16>, vector<8x256xf32> -> vector<8x256xf32>
    %c0_9 = arith.constant 0 : index
    %c0_10 = arith.constant 0 : index
    %13 = vector.load %arg5[%c0_9, %c0_10] : memref<1x256xf32, #tpu.memory_space<vmem>>, vector<1x256xf32>
    %14 = vector.broadcast %13 : vector<1x256xf32> to vector<8x256xf32>
    %15 = arith.addf %12, %14 : vector<8x256xf32>
    %cst_11 = arith.constant 0.000000e+00 : f32
    %16 = vector.broadcast %cst_11 : f32 to vector<8x256xf32>
    %17 = arith.maximumf %15, %16 : vector<8x256xf32>
    %18 = arith.addf %17, %9 : vector<8x256xf32>
    %19 = arith.truncf %18 : vector<8x256xf32> to vector<8x256xbf16>
    %c0_12 = arith.constant 0 : index
    %c0_13 = arith.constant 0 : index
    %20 = vector.load %arg6[%c0_12, %c0_13] : memref<256x256xbf16, #tpu.memory_space<vmem>>, vector<256x256xbf16>
    %cst_14 = arith.constant dense<0.000000e+00> : vector<8x256xf32>
    %21 = tpu.matmul %19, %20, %cst_14 {dimension_numbers = #tpu.dot_dimension_numbers<[1], [0], [0], [1], [0, 0, 1, 1], [], []>} : vector<8x256xbf16>, vector<256x256xbf16>, vector<8x256xf32> -> vector<8x256xf32>
    %c0_15 = arith.constant 0 : index
    %c0_16 = arith.constant 0 : index
    %22 = vector.load %arg7[%c0_15, %c0_16] : memref<1x256xf32, #tpu.memory_space<vmem>>, vector<1x256xf32>
    %23 = vector.broadcast %22 : vector<1x256xf32> to vector<8x256xf32>
    %24 = arith.addf %21, %23 : vector<8x256xf32>
    %cst_17 = arith.constant 0.000000e+00 : f32
    %25 = vector.broadcast %cst_17 : f32 to vector<8x256xf32>
    %26 = arith.maximumf %24, %25 : vector<8x256xf32>
    %27 = arith.addf %26, %18 : vector<8x256xf32>
    %28 = arith.truncf %27 : vector<8x256xf32> to vector<8x256xbf16>
    %c0_18 = arith.constant 0 : index
    %c0_19 = arith.constant 0 : index
    %29 = vector.load %arg8[%c0_18, %c0_19] : memref<256x128xbf16, #tpu.memory_space<vmem>>, vector<256x128xbf16>
    %cst_20 = arith.constant dense<0.000000e+00> : vector<8x128xf32>
    %30 = tpu.matmul %28, %29, %cst_20 {dimension_numbers = #tpu.dot_dimension_numbers<[1], [0], [0], [1], [0, 0, 1, 1], [], []>} : vector<8x256xbf16>, vector<256x128xbf16>, vector<8x128xf32> -> vector<8x128xf32>
    %c0_21 = arith.constant 0 : index
    %c0_22 = arith.constant 0 : index
    %31 = vector.load %arg9[%c0_21, %c0_22] : memref<1x128xf32, #tpu.memory_space<vmem>>, vector<1x128xf32>
    %32 = vector.broadcast %31 : vector<1x128xf32> to vector<8x128xf32>
    %33 = arith.addf %30, %32 : vector<8x128xf32>
    %c0_23 = arith.constant 0 : index
    %c0_24 = arith.constant 0 : index
    %34 = vector.load %arg10[%c0_23, %c0_24] : memref<8x128xf32, #tpu.memory_space<vmem>>, vector<8x128xf32>
    tpu.vector_store %arg10[%c0_23, %c0_24], %33 {strides = array<i32>} : memref<8x128xf32, #tpu.memory_space<vmem>>, vector<8x128xf32>,
    return
  }
  func.func @transform_0(%arg0: i32) -> (i32, i32) {
    %c0_i32 = arith.constant 0 : i32
    %c0_i32_0 = arith.constant 0 : i32
    return %arg0, %c0_i32 : i32, i32
  }
  func.func @transform_1(%arg0: i32) -> (i32, i32) {
    %c0_i32 = arith.constant 0 : i32
    %c0_i32_0 = arith.constant 0 : i32
    %c0_i32_1 = arith.constant 0 : i32
    return %c0_i32, %c0_i32_0 : i32, i32
  }
  func.func @transform_2(%arg0: i32) -> (i32, i32) {
    %c0_i32 = arith.constant 0 : i32
    %c0_i32_0 = arith.constant 0 : i32
    %c0_i32_1 = arith.constant 0 : i32
    return %c0_i32, %c0_i32_0 : i32, i32
  }
  func.func @transform_3(%arg0: i32) -> (i32, i32) {
    %c0_i32 = arith.constant 0 : i32
    %c0_i32_0 = arith.constant 0 : i32
    %c0_i32_1 = arith.constant 0 : i32
    return %c0_i32, %c0_i32_0 : i32, i32
  }
  func.func @transform_4(%arg0: i32) -> (i32, i32) {
    %c0_i32 = arith.constant 0 : i32
    %c0_i32_0 = arith.constant 0 : i32
    %c0_i32_1 = arith.constant 0 : i32
    return %c0_i32, %c0_i32_0 : i32, i32
  }
  func.func @transform_5(%arg0: i32) -> (i32, i32) {
    %c0_i32 = arith.constant 0 : i32
    %c0_i32_0 = arith.constant 0 : i32
    %c0_i32_1 = arith.constant 0 : i32
    return %c0_i32, %c0_i32_0 : i32, i32
  }
  func.func @transform_6(%arg0: i32) -> (i32, i32) {
    %c0_i32 = arith.constant 0 : i32
    %c0_i32_0 = arith.constant 0 : i32
    %c0_i32_1 = arith.constant 0 : i32
    return %c0_i32, %c0_i32_0 : i32, i32
  }
  func.func @transform_7(%arg0: i32) -> (i32, i32) {
    %c0_i32 = arith.constant 0 : i32
    %c0_i32_0 = arith.constant 0 : i32
    %c0_i32_1 = arith.constant 0 : i32
    return %c0_i32, %c0_i32_0 : i32, i32
  }
  func.func @transform_8(%arg0: i32) -> (i32, i32) {
    %c0_i32 = arith.constant 0 : i32
    %c0_i32_0 = arith.constant 0 : i32
    %c0_i32_1 = arith.constant 0 : i32
    return %c0_i32, %c0_i32_0 : i32, i32
  }
  func.func @transform_9(%arg0: i32) -> (i32, i32) {
    %c0_i32 = arith.constant 0 : i32
    %c0_i32_0 = arith.constant 0 : i32
    return %arg0, %c0_i32 : i32, i32
  }
}

</mosaic_0001>

<bundles_post_ra>
// kernel: tpu_custom_call.1
= control target key start
LH: loop header
LB: loop body
LE: loop exit
PB: predicated region body
PF: predicated region fallthrough
CT: control target
= control target key end

     0   :  { %14 = vsyncpa [#allocation3], 0  ;;  %s1602_s0 = inlined_call_operand.hbm [shape: f32[8,256], index: 0, kind: input, shape index: {}]   ;;  %s1603_s1 = inlined_call_operand.hbm [shape: bf16[256,256], index: 1, kind: input, shape index: {}]   ;;  %s1604_s2 = inlined_call_operand.vmem [shape: f32[1,256], index: 2, kind: input, shape index: {}]   ;;  %s1605_s3 = inlined_call_operand.hbm [shape: bf16[256,256], index: 3, kind: input, shape index: {}]   ;;  %s1606_s4 = inlined_call_operand.vmem [shape: f32[1,256], index: 4, kind: input, shape index: {}]   ;;  %s1607_s5 = inlined_call_operand.hbm [shape: bf16[256,256], index: 5, kind: input, shape index: {}]   ;;  %s1608_s6 = inlined_call_operand.vmem [shape: f32[1,256], index: 6, kind: input, shape index: {}]   ;;  %s1609_s7 = inlined_call_operand.hbm [shape: bf16[256,128], index: 7, kind: input, shape index: {}]   ;;  %s1610_s8 = inlined_call_operand.vmem [shape: f32[1,128], index: 8, kind: input, shape index: {}]   ;;  %s1611_s9 = inlined_call_operand.hbm [shape: f32[8,128], index: 9, kind: output, shape index: {}]  }
   0x1   :  { %15 = vsyncpa [#allocation6], 0 }
   0x2   :  { %16 = vsyncpa [#allocation9], 0 }
   0x3   :  { %17 = vsyncpa [#allocation4], 0  ;;  %s1483_s30 = smov [#allocation5]  }
   0x4   :  { %s33_s10 = sshll.u32 %s1483_s30, 4  ;;  %s34_s10 = int_to_ptr.vmem [resolvable:$true] %s33_s10 }
   0x5   :  { %s1363_s11 = scalar_lea.vmem %s34_s10, 4096  ;;  %p1368_p1 = scmp.lt.s32.totalorder %s34_s10, %s34_s10 }
   0x6   :  { %p1364_p0 = scmp.ne.s32.totalorder %s34_s10, %s1363_s11  ;;  %p1369_p2 = scmp.lt.s32.totalorder %s1363_s11, %s1363_s11 }
   0x8   :  { %p1370_p3 = por %p1369_p2, %p1368_p1 }
   0xa   :  { %p1371_p4 = pnand %p1370_p3, %p1364_p0 }
   0xc   :  { %1374 = shalt.err (!%p1371_p4)
}
   0xd   :  { %s1484_s12 = smov 128   ;;  %s1485_s13 = smov 8  }
   0xe   :  { %39 = dma.hbm_to_vmem [thread:$0]  %s1603_s1, 4096, %s34_s10, [#allocation6], %s1484_s12, %s1484_s12, %s1485_s13  }
   0xf   :  { %s1486_s16 = smov [#allocation8]   ;;  %s1487_s18 = smov [#allocation2]  }
  0x10   :  { %s61_s17 = sshll.u32 %s1486_s16, 4  ;;  %s24_s19 = sshll.u32 %s1487_s18, 4  ;;  %s62_s17 = int_to_ptr.vmem [resolvable:$true] %s61_s17  ;;  %s25_s19 = int_to_ptr.vmem [resolvable:$true] %s24_s19 }
  0x11   :  { %s1383_s20 = scalar_lea.vmem %s62_s17, 4096  ;;  %p1388_p6 = scmp.lt.s32.totalorder %s62_s17, %s62_s17 }
  0x12   :  { %p1384_p5 = scmp.ne.s32.totalorder %s62_s17, %s1383_s20  ;;  %p1389_p7 = scmp.lt.s32.totalorder %s1383_s20, %s1383_s20 }
  0x14   :  { %p1390_p8 = por %p1389_p7, %p1388_p6 }
  0x16   :  { %p1391_p9 = pnand %p1390_p8, %p1384_p5 }
  0x18   :  { %1394 = shalt.err (!%p1391_p9)
}
  0x19   :  { %67 = dma.hbm_to_vmem [thread:$0]  %s1607_s5, 4096, %s62_s17, [#allocation9], %s1484_s12, %s1484_s12, %s1485_s13  }
  0x1a   :  { %s1403_s1 = scalar_lea.vmem %s25_s19, 256  ;;  %p1408_p11 = scmp.lt.s32.totalorder %s25_s19, %s25_s19 }
  0x1b   :  { %p1404_p10 = scmp.ne.s32.totalorder %s25_s19, %s1403_s1  ;;  %p1409_p12 = scmp.lt.s32.totalorder %s1403_s1, %s1403_s1 }
  0x1d   :  { %p1410_p13 = por %p1409_p12, %p1408_p11 }
  0x1f   :  { %p1411_p0 = pnand %p1410_p13, %p1404_p10 }
  0x21   :  { %1414 = shalt.err (!%p1411_p0)
}
  0x22   :  { %27 = dma.hbm_to_vmem [thread:$0]  %s1602_s0, 256, %s25_s19, [#allocation3]  }
  0x23   :  { %s1488_s25 = smov [#allocation7]   ;;  %s1489_s27 = smov [#allocation10]  }
  0x24   :  { %s47_s26 = sshll.u32 %s1488_s25, 4  ;;  %s75_s28 = sshll.u32 %s1489_s27, 4  ;;  %s48_s26 = int_to_ptr.vmem [resolvable:$true] %s47_s26  ;;  %s76_s28 = int_to_ptr.vmem [resolvable:$true] %s75_s28 }
  0x25   :  { %s1423_s29 = scalar_lea.vmem %s48_s26, 4096  ;;  %p1428_p2 = scmp.lt.s32.totalorder %s48_s26, %s48_s26 }
  0x26   :  { %p1424_p1 = scmp.ne.s32.totalorder %s48_s26, %s1423_s29  ;;  %p1429_p3 = scmp.lt.s32.totalorder %s1423_s29, %s1423_s29 }
  0x28   :  { %p1430_p4 = por %p1429_p3, %p1428_p2 }
  0x2a   :  { %p1431_p5 = pnand %p1430_p4, %p1424_p1 }
  0x2c   :  { %1434 = shalt.err (!%p1431_p5)
}
  0x2d   :  { %53 = dma.hbm_to_vmem [thread:$0]  %s1605_s3, 4096, %s48_s26, [#allocation6], %s1484_s12, %s1484_s12, %s1485_s13  }
  0x2e   :  { %s1443_s0 = scalar_lea.vmem %s76_s28, 2048  ;;  %p1448_p7 = scmp.lt.s32.totalorder %s76_s28, %s76_s28 }
  0x2f   :  { %p1444_p6 = scmp.ne.s32.totalorder %s76_s28, %s1443_s0  ;;  %p1449_p8 = scmp.lt.s32.totalorder %s1443_s0, %s1443_s0 }
  0x31   :  { %p1450_p9 = por %p1449_p8, %p1448_p7 }
  0x33   :  { %p1451_p10 = pnand %p1450_p9, %p1444_p6 }
  0x35   :  { %1454 = shalt.err (!%p1451_p10)
}
  0x36   :  { %s1490_s10 = smov 64   ;;  %s1491_s11 = smov 4  }
  0x37   :  { %81 = dma.hbm_to_vmem [thread:$0]  %s1609_s7, 2048, %s76_s28, [#allocation9], %s1490_s10, %s1490_s10, %s1491_s11  }
  0x38   :  { %1475 = dma.done.wait [#allocation3], 256  }
  0x39   :  { %1476 = vsyncadd [#allocation3], 4294967040 }
  0x3a   :  { %1477 = dma.done.wait [#allocation6], 8192  }
  0x3b   :  { %1478 = vsyncadd [#allocation6], 4294959104 }
  0x3c   :  { %1479 = dma.done.wait [#allocation9], 6144  }
  0x3d   :  { %1480 = vsyncadd [#allocation9], 4294961152  ;;  %v1195_v0 = vld [vmem:[#allocation5 + $0x74] ss:$8 sps:$4 sm:$0xff]   ;;  %v1197_v1 = vld [vmem:[#allocation5 + $0x70] ss:$8 sps:$4 sm:$0xff]  }
  0x3e   :  { %308 = vmatprep.subr.bf16.mxu0 %v1195_v0  ;;  %v1198_v2 = vld [vmem:[#allocation5 + $0x64] ss:$8 sps:$4 sm:$0xff]   ;;  %v1200_v3 = vld [vmem:[#allocation5 + $0x60] ss:$8 sps:$4 sm:$0xff]   ;;  %v1201_v4 = vld [vmem:[#allocation5 + $0x54] ss:$8 sps:$4 sm:$0xff]  }
  0x3f   :  { %309 = vmatpush1.bf16.msra.mxu0 %v1197_v1  ;;  %v1203_v5 = vld [vmem:[#allocation5 + $0x50] ss:$8 sps:$4 sm:$0xff]   ;;  %v1204_v6 = vld [vmem:[#allocation5 + $0x44] ss:$8 sps:$4 sm:$0xff]   ;;  %v1206_v7 = vld [vmem:[#allocation5 + $0x40] ss:$8 sps:$4 sm:$0xff]  }
  0x40   :  { %310 = vmatprep.subr.bf16.mxu0 %v1198_v2  ;;  %v1207_v8 = vld [vmem:[#allocation5 + $0x34] ss:$8 sps:$4 sm:$0xff]   ;;  %v1209_v9 = vld [vmem:[#allocation5 + $0x30] ss:$8 sps:$4 sm:$0xff]   ;;  %v1210_v10 = vld [vmem:[#allocation5 + $0x24] ss:$8 sps:$4 sm:$0xff]  }
  0x41   :  { %v1212_v11 = vld [vmem:[#allocation5 + $0x20] ss:$8 sps:$4 sm:$0xff]   ;;  %v1213_v12 = vld [vmem:[#allocation5 + $0x14] ss:$8 sps:$4 sm:$0xff]   ;;  %v1215_v13 = vld [vmem:[#allocation5 + $0x10] ss:$8 sps:$4 sm:$0xff]  }
  0x42   :  { %v1567_v14 = vld [vmem:[#allocation2 + $0x8] sm:$0xff]  ;;  %v1216_v18 = vld [vmem:[#allocation5 + $0x4] ss:$8 sps:$4 sm:$0xff]   ;;  %v1218_v20 = vld [vmem:[#allocation5] ss:$8 sps:$4 sm:$0xff]   ;;  %s1492_s17 = smov [#allocation11]  }
  0x43   :  { %311 = vmatpush1.bf16.msra.mxu0 %v1200_v3  ;;  %v103_v15 = vpack.c.bf16 %v1567_v14, %v1567_v14  ;;  %v1243_v16 = vld [vmem:[#allocation7 + $0x74] ss:$8 sps:$4 sm:$0xff]   ;;  %v1245_v17 = vld [vmem:[#allocation7 + $0x70] ss:$8 sps:$4 sm:$0xff]   ;;  %v1246_v19 = vld [vmem:[#allocation7 + $0x64] ss:$8 sps:$4 sm:$0xff]  }
  0x44   :  { %312 = vmatprep.subr.bf16.mxu0 %v1201_v4  ;;  %559 = vmatprep.subr.bf16.mxu1 %v1243_v16  ;;  %v1248_v21 = vld [vmem:[#allocation7 + $0x60] ss:$8 sps:$4 sm:$0xff]   ;;  %v1249_v22 = vld [vmem:[#allocation7 + $0x54] ss:$8 sps:$4 sm:$0xff]   ;;  %v1221_v24 = vld [vmem:[#allocation5 + $0xf0] ss:$8 sps:$4 sm:$0xff]  }
  0x45   :  { %340 = vmatprep.mubr.bf16.mxu0 %v103_v15  ;;  %560 = vmatpush1.bf16.msra.mxu1 %v1245_v17  ;;  %v1219_v23 = vld [vmem:[#allocation5 + $0xf4] ss:$8 sps:$4 sm:$0xff]   ;;  %v1251_v25 = vld [vmem:[#allocation7 + $0x50] ss:$8 sps:$4 sm:$0xff]   ;;  %v1252_v26 = vld [vmem:[#allocation7 + $0x44] ss:$8 sps:$4 sm:$0xff]  }
  0x46   :  { %561 = vmatprep.subr.bf16.mxu1 %v1246_v19  ;;  %v1222_v27 = vld [vmem:[#allocation5 + $0xe4] ss:$8 sps:$4 sm:$0xff]   ;;  %v1224_v28 = vld [vmem:[#allocation5 + $0xe0] ss:$8 sps:$4 sm:$0xff]   ;;  %v1255_v30 = vld [vmem:[#allocation7 + $0x34] ss:$8 sps:$4 sm:$0xff]  }
  0x47   :  { %313 = vmatpush1.bf16.msra.mxu0 %v1203_v5  ;;  %v1254_v29 = vld [vmem:[#allocation7 + $0x40] ss:$8 sps:$4 sm:$0xff]   ;;  %v1225_v31 = vld [vmem:[#allocation5 + $0xd4] ss:$8 sps:$4 sm:$0xff]   ;;  %v1227_v32 = vld [vmem:[#allocation5 + $0xd0] ss:$8 sps:$4 sm:$0xff]  }
  0x48   :  { %314 = vmatprep.subr.bf16.mxu0 %v1204_v6  ;;  %v1257_v33 = vld [vmem:[#allocation7 + $0x30] ss:$8 sps:$4 sm:$0xff]   ;;  %v1228_v34 = vld [vmem:[#allocation5 + $0xc4] ss:$8 sps:$4 sm:$0xff]   ;;  %v1260_v36 = vld [vmem:[#allocation7 + $0x20] ss:$8 sps:$4 sm:$0xff]  }
  0x49   :  { %562 = vmatpush1.bf16.msra.mxu1 %v1248_v21  ;;  %v1258_v35 = vld [vmem:[#allocation7 + $0x24] ss:$8 sps:$4 sm:$0xff]   ;;  %v1230_v37 = vld [vmem:[#allocation5 + $0xc0] ss:$8 sps:$4 sm:$0xff]   ;;  %v1261_v38 = vld [vmem:[#allocation7 + $0x14] ss:$8 sps:$4 sm:$0xff]  }
  0x4a   :  { %563 = vmatprep.subr.bf16.mxu1 %v1249_v22  ;;  %v1231_v39 = vld [vmem:[#allocation5 + $0xb4] ss:$8 sps:$4 sm:$0xff]   ;;  %v1263_v40 = vld [vmem:[#allocation7 + $0x10] ss:$8 sps:$4 sm:$0xff]   ;;  %v1264_v42 = vld [vmem:[#allocation7 + $0x4] ss:$8 sps:$4 sm:$0xff]  }
  0x4b   :  { %315 = vmatpush1.bf16.msra.mxu0 %v1206_v7  ;;  %v1233_v41 = vld [vmem:[#allocation5 + $0xb0] ss:$8 sps:$4 sm:$0xff]   ;;  %v1234_v43 = vld [vmem:[#allocation5 + $0xa4] ss:$8 sps:$4 sm:$0xff]   ;;  %v1266_v44 = vld [vmem:[#allocation7] ss:$8 sps:$4 sm:$0xff]  }
  0x4c   :  { %316 = vmatprep.subr.bf16.mxu0 %v1207_v8  ;;  %v1236_v45 = vld [vmem:[#allocation5 + $0xa0] ss:$8 sps:$4 sm:$0xff]   ;;  %v1267_v46 = vld [vmem:[#allocation7 + $0xf4] ss:$8 sps:$4 sm:$0xff]   ;;  %v1269_v48 = vld [vmem:[#allocation7 + $0xf0] ss:$8 sps:$4 sm:$0xff]  }
  0x4d   :  { %564 = vmatpush1.bf16.msra.mxu1 %v1251_v25  ;;  %v1237_v47 = vld [vmem:[#allocation5 + $0x94] ss:$8 sps:$4 sm:$0xff]   ;;  %v1239_v49 = vld [vmem:[#allocation5 + $0x90] ss:$8 sps:$4 sm:$0xff]   ;;  %v1270_v50 = vld [vmem:[#allocation7 + $0xe4] ss:$8 sps:$4 sm:$0xff]  }
  0x4e   :  { %565 = vmatprep.subr.bf16.mxu1 %v1252_v26  ;;  %v1240_v51 = vld [vmem:[#allocation5 + $0x84] ss:$8 sps:$4 sm:$0xff]   ;;  %v1272_v52 = vld [vmem:[#allocation7 + $0xe0] ss:$8 sps:$4 sm:$0xff]   ;;  %v1571_v54 = vld [vmem:[#allocation2] sm:$0xff]  ;;  %s1039_s18 = sshll.u32 %s1492_s17, 4  ;;  %s1040_s18 = int_to_ptr.vmem [resolvable:$true] %s1039_s18 }
  0x4f   :  { %317 = vmatpush1.bf16.msra.mxu0 %v1209_v9  ;;  %v1242_v53 = vld [vmem:[#allocation5 + $0x80] ss:$8 sps:$4 sm:$0xff]   ;;  %v1273_v55 = vld [vmem:[#allocation7 + $0xd4] ss:$8 sps:$4 sm:$0xff]   ;;  %v1275_v56 = vld [vmem:[#allocation7 + $0xd0] ss:$8 sps:$4 sm:$0xff]   ;;  %v102_v57 = vpack.c.bf16 %v1571_v54, %v1571_v54  ;;  %p1460_p12 = scmp.lt.s32.totalorder %s1040_s18, %s1040_s18 }
  0x50   :  { %318 = vmatprep.subr.bf16.mxu0 %v1210_v10  ;;  %v1276_v58 = vld [vmem:[#allocation7 + $0xc4] ss:$8 sps:$4 sm:$0xff]   ;;  %v1278_v59 = vld [vmem:[#allocation7 + $0xc0] ss:$8 sps:$4 sm:$0xff]   ;;  %v1279_v60 = vld [vmem:[#allocation7 + $0xb4] ss:$8 sps:$4 sm:$0xff]  }
  0x51   :  { %566 = vmatpush1.bf16.msra.mxu1 %v1254_v29  ;;  %v1281_v61 = vld [vmem:[#allocation7 + $0xb0] ss:$8 sps:$4 sm:$0xff]   ;;  %v1282_v62 = vld [vmem:[#allocation7 + $0xa4] ss:$8 sps:$4 sm:$0xff]   ;;  %v1284_v63 = vld [vmem:[#allocation7 + $0xa0] ss:$8 sps:$4 sm:$0xff]  }
  0x52   :  { %567 = vmatprep.subr.bf16.mxu1 %v1255_v30  ;;  %v1285_v0 = vld [vmem:[#allocation7 + $0x94] ss:$8 sps:$4 sm:$0xff]   ;;  %v1287_v1 = vld [vmem:[#allocation7 + $0x90] ss:$8 sps:$4 sm:$0xff]   ;;  %v1288_v2 = vld [vmem:[#allocation7 + $0x84] ss:$8 sps:$4 sm:$0xff]  }
  0x53   :  { %319 = vmatpush1.bf16.msra.mxu0 %v1212_v11  ;;  %v1290_v3 = vld [vmem:[#allocation7 + $0x80] ss:$8 sps:$4 sm:$0xff]   ;;  %v1291_v4 = vld [vmem:[#allocation8 + $0x70] ss:$8 sps:$4 sm:$0xff]   ;;  %v1293_v5 = vld [vmem:[#allocation8 + $0x74] ss:$8 sps:$4 sm:$0xff]  }
  0x54   :  { %320 = vmatprep.subr.bf16.mxu0 %v1213_v12  ;;  %v1296_v6 = vld [vmem:[#allocation8 + $0x64] ss:$8 sps:$4 sm:$0xff]   ;;  %v1294_v7 = vld [vmem:[#allocation8 + $0x60] ss:$8 sps:$4 sm:$0xff]   ;;  %v1299_v8 = vld [vmem:[#allocation8 + $0x54] ss:$8 sps:$4 sm:$0xff]  }
  0x55   :  { %568 = vmatpush1.bf16.msra.mxu1 %v1257_v33  ;;  %v1297_v9 = vld [vmem:[#allocation8 + $0x50] ss:$8 sps:$4 sm:$0xff]   ;;  %v1302_v10 = vld [vmem:[#allocation8 + $0x44] ss:$8 sps:$4 sm:$0xff]   ;;  %v1300_v11 = vld [vmem:[#allocation8 + $0x40] ss:$8 sps:$4 sm:$0xff]  }
  0x56   :  { %569 = vmatprep.subr.bf16.mxu1 %v1258_v35  ;;  %v1305_v12 = vld [vmem:[#allocation8 + $0x34] ss:$8 sps:$4 sm:$0xff]   ;;  %v1308_v15 = vld [vmem:[#allocation8 + $0x24] ss:$8 sps:$4 sm:$0xff]   ;;  %v1306_v16 = vld [vmem:[#allocation8 + $0x20] ss:$8 sps:$4 sm:$0xff]  }
  0x57   :  { %321 = vmatpush1.bf16.msra.mxu0 %v1215_v13  ;;  %v1303_v13 = vld [vmem:[#allocation8 + $0x30] ss:$8 sps:$4 sm:$0xff]   ;;  %v1311_v17 = vld [vmem:[#allocation8 + $0x14] ss:$8 sps:$4 sm:$0xff]   ;;  %v1314_v19 = vld [vmem:[#allocation8 + $0x4] ss:$8 sps:$4 sm:$0xff]  }
  0x58   :  { %322 = vmatprep.subr.bf16.mxu0 %v1216_v18  ;;  %v1309_v18 = vld [vmem:[#allocation8 + $0x10] ss:$8 sps:$4 sm:$0xff]   ;;  %v1317_v21 = vld [vmem:[#allocation8 + $0xf4] ss:$8 sps:$4 sm:$0xff]   ;;  %s1455_s19 = scalar_lea.vmem %s1040_s18, 128 }
  0x59   :  { %570 = vmatpush1.bf16.msra.mxu1 %v1260_v36  ;;  %v1315_v22 = vld [vmem:[#allocation8 + $0xf0] ss:$8 sps:$4 sm:$0xff]   ;;  %v1323_v25 = vld [vmem:[#allocation8 + $0xd4] ss:$8 sps:$4 sm:$0xff]   ;;  %p1456_p11 = scmp.ne.s32.totalorder %s1040_s18, %s1455_s19  ;;  %p1461_p13 = scmp.lt.s32.totalorder %s1455_s19, %s1455_s19 }
  0x5a   :  { %571 = vmatprep.subr.bf16.mxu1 %v1261_v38  ;;  %v1321_v26 = vld [vmem:[#allocation8 + $0xd0] ss:$8 sps:$4 sm:$0xff]   ;;  %v1329_v29 = vld [vmem:[#allocation8 + $0xb4] ss:$8 sps:$4 sm:$0xff]  }
  0x5b   :  { %323 = vmatpush1.bf16.msra.mxu0 %v1218_v20  ;;  %v1312_v20 = vld [vmem:[#allocation8] ss:$8 sps:$4 sm:$0xff]   ;;  %v1327_v30 = vld [vmem:[#allocation8 + $0xb0] ss:$8 sps:$4 sm:$0xff]   ;;  %p1462_p0 = por %p1461_p13, %p1460_p12 }
  0x5c   :  { %324 = vmatprep.subr.bf16.mxu0 %v1219_v23  ;;  %v1320_v23 = vld [vmem:[#allocation8 + $0xe4] ss:$8 sps:$4 sm:$0xff]  }
  0x5d   :  { %572 = vmatpush1.bf16.msra.mxu1 %v1263_v40  ;;  %p1463_p1 = pnand %p1462_p0, %p1456_p11 }
  0x5e   :  { %573 = vmatprep.subr.bf16.mxu1 %v1264_v42 }
  0x5f   :  { %325 = vmatpush2.bf16.msra.mxu0 %v1221_v24  ;;  %v1318_v24 = vld [vmem:[#allocation8 + $0xe0] ss:$8 sps:$4 sm:$0xff]  }
  0x60   :  { %326 = vmatprep.subr.bf16.mxu0 %v1222_v27  ;;  %v1326_v27 = vld [vmem:[#allocation8 + $0xc4] ss:$8 sps:$4 sm:$0xff]  }
  0x61   :  { %574 = vmatpush1.bf16.msra.mxu1 %v1266_v44 }
  0x62   :  { %575 = vmatprep.subr.bf16.mxu1 %v1267_v46 }
  0x63   :  { %327 = vmatpush2.bf16.msra.mxu0 %v1224_v28  ;;  %v1324_v28 = vld [vmem:[#allocation8 + $0xc0] ss:$8 sps:$4 sm:$0xff]  }
  0x64   :  { %328 = vmatprep.subr.bf16.mxu0 %v1225_v31  ;;  %v138_v31 = vlaneseq }
  0x65   :  { %576 = vmatpush2.bf16.msra.mxu1 %v1269_v48 }
  0x66   :  { %577 = vmatprep.subr.bf16.mxu1 %v1270_v50  ;;  %v1332_v50 = vld [vmem:[#allocation8 + $0xa4] ss:$8 sps:$4 sm:$0xff]  }
  0x67   :  { %329 = vmatpush2.bf16.msra.mxu0 %v1227_v32  ;;  %v139_v32 = vshrl.u32 %v138_v31, 7 }
  0x68   :  { %330 = vmatprep.subr.bf16.mxu0 %v1228_v34  ;;  %v136_v34 = vld [vmem:[%s1604_s2] sm:$0x3] }
  0x69   :  { %578 = vmatpush2.bf16.msra.mxu1 %v1272_v52  ;;  %v1575_v33 = vsub.s32 0, %v139_v32  ;;  %v1580_v35 = vsub.s32 1, %v139_v32  ;;  %v1335_v52 = vld [vmem:[#allocation8 + $0x94] ss:$8 sps:$4 sm:$0xff]  }
  0x6a   :  { %579 = vmatprep.subr.bf16.mxu1 %v1273_v55  ;;  %v1338_v55 = vld [vmem:[#allocation8 + $0x84] ss:$8 sps:$4 sm:$0xff]  }
  0x6b   :  { %331 = vmatpush2.bf16.msra.mxu0 %v1230_v37  ;;  %v141_v36 = vrot.slane %v136_v34, %v1575_v33  ;;  %v145_v37 = vrot.slane %v136_v34, %v1580_v35 }
  0x6c   :  { %332 = vmatprep.subr.bf16.mxu0 %v1231_v39 }
  0x6d   :  { %580 = vmatpush2.bf16.msra.mxu1 %v1275_v56  ;;  %v1336_v56 = vld [vmem:[#allocation8 + $0x80] ss:$8 sps:$4 sm:$0xff]  }
  0x6e   :  { %581 = vmatprep.subr.bf16.mxu1 %v1276_v58  ;;  %v1341_v58 = vld [vmem:[#allocation10 + $0x70] sm:$0xff]  }
  0x6f   :  { %333 = vmatpush2.bf16.msra.mxu0 %v1233_v41 }
  0x70   :  { %334 = vmatprep.subr.bf16.mxu0 %v1234_v43 }
  0x71   :  { %582 = vmatpush2.bf16.msra.mxu1 %v1278_v59  ;;  %v1343_v59 = vld [vmem:[#allocation10 + $0x68] sm:$0xff]  }
  0x72   :  { %583 = vmatprep.subr.bf16.mxu1 %v1279_v60  ;;  %v1344_v60 = vld [vmem:[#allocation10 + $0x28] sm:$0xff]  }
  0x73   :  { %335 = vmatpush2.bf16.msra.mxu0 %v1236_v45 }
  0x74   :  { %336 = vmatprep.subr.bf16.mxu0 %v1237_v47 }
  0x75   :  { %584 = vmatpush2.bf16.msra.mxu1 %v1281_v61  ;;  %v1345_v61 = vld [vmem:[#allocation10 + $0x60] sm:$0xff]  }
  0x76   :  { %585 = vmatprep.subr.bf16.mxu1 %v1282_v62  ;;  %v1346_v62 = vld [vmem:[#allocation10 + $0x20] sm:$0xff]  }
  0x77   :  { %337 = vmatpush2.bf16.msra.mxu0 %v1239_v49 }
  0x78   :  { %338 = vmatprep.subr.bf16.mxu0 %v1240_v51  ;;  %v1330_v51 = vld [vmem:[#allocation8 + $0xa0] ss:$8 sps:$4 sm:$0xff]  }
  0x79   :  { %586 = vmatpush2.bf16.msra.mxu1 %v1284_v63  ;;  %v1347_v63 = vld [vmem:[#allocation10 + $0x58] sm:$0xff]  }
  0x7a   :  { %587 = vmatprep.subr.bf16.mxu1 %v1285_v0  ;;  %v1348_v0 = vld [vmem:[#allocation10 + $0x18] sm:$0xff]  }
  0x7b   :  { %339 = vmatpush2.bf16.msra.mxu0 %v1242_v53  ;;  %v1333_v53 = vld [vmem:[#allocation8 + $0x90] ss:$8 sps:$4 sm:$0xff]  }
  0x7c   :  { %810 = vmatprep.subr.bf16.mxu0 %v1293_v5 }
  0x7d   :  { %588 = vmatpush2.bf16.msra.mxu1 %v1287_v1  ;;  %v387_v1 = vld [vmem:[%s1606_s4] sm:$0x3] }
  0x7e   :  { %341 = vmatmul.mubr.bf16.vlgmr.msra.gmra.mxu0 %v102_v57  ;;  %589 = vmatprep.subr.bf16.mxu1 %v1288_v2  ;;  %v1340_v57 = vld [vmem:[#allocation10 + $0x38] sm:$0xff]   ;;  %v392_v2 = vrot.slane %v387_v1, %v1575_v33 }
  0x7f   :  { %811 = vmatpush1.bf16.msra.mxu0 %v1291_v4 }
  0x80   :  { %812 = vmatprep.subr.bf16.mxu0 %v1296_v6 }
  0x81   :  { %590 = vmatpush2.bf16.msra.mxu1 %v1290_v3  ;;  %v396_v3 = vrot.slane %v387_v1, %v1580_v35 }
  0x83   :  { %813 = vmatpush1.bf16.msra.mxu0 %v1294_v7 }
  0x84   :  { %814 = vmatprep.subr.bf16.mxu0 %v1299_v8 }
  0x87   :  { %815 = vmatpush1.bf16.msra.mxu0 %v1297_v9 }
  0x88   :  { %816 = vmatprep.subr.bf16.mxu0 %v1302_v10 }
  0x8b   :  { %817 = vmatpush1.bf16.msra.mxu0 %v1300_v11 }
  0x8c   :  { %818 = vmatprep.subr.bf16.mxu0 %v1305_v12 }
  0x8f   :  { %819 = vmatpush1.bf16.msra.mxu0 %v1303_v13 }
  0x90   :  { %820 = vmatprep.subr.bf16.mxu0 %v1308_v15 }
  0x93   :  { %821 = vmatpush1.bf16.msra.mxu0 %v1306_v16 }
  0x94   :  { %822 = vmatprep.subr.bf16.mxu0 %v1311_v17  ;;  %v1349_v17 = vld [vmem:[#allocation10 + $0x50] sm:$0xff]  }
  0x97   :  { %823 = vmatpush1.bf16.msra.mxu0 %v1309_v18  ;;  %v1350_v18 = vld [vmem:[#allocation10 + $0x10] sm:$0xff]  }
  0x98   :  { %824 = vmatprep.subr.bf16.mxu0 %v1314_v19  ;;  %v1351_v19 = vld [vmem:[#allocation10 + $0x48] sm:$0xff]  }
  0x9b   :  { %825 = vmatpush1.bf16.msra.mxu0 %v1312_v20  ;;  %v1352_v20 = vld [vmem:[#allocation10 + $0x8] sm:$0xff]  }
  0x9c   :  { %826 = vmatprep.subr.bf16.mxu0 %v1317_v21  ;;  %v1353_v21 = vld [vmem:[#allocation10 + $0x40] sm:$0xff]  }
  0x9f   :  { %827 = vmatpush2.bf16.msra.mxu0 %v1315_v22  ;;  %v1354_v22 = vld [vmem:[#allocation10] sm:$0xff]  }
  0xa0   :  { %828 = vmatprep.subr.bf16.mxu0 %v1320_v23  ;;  %v638_v23 = vld [vmem:[%s1608_s6] sm:$0x3] }
  0xa3   :  { %829 = vmatpush2.bf16.msra.mxu0 %v1318_v24  ;;  %v643_v24 = vrot.slane %v638_v23, %v1575_v33  ;;  %v1146_v33 = vld [vmem:[%s1610_s8] ss:$0 sm:$0xff] }
  0xa4   :  { %830 = vmatprep.subr.bf16.mxu0 %v1323_v25  ;;  %v647_v25 = vrot.slane %v638_v23, %v1580_v35 }
  0xa7   :  { %831 = vmatpush2.bf16.msra.mxu0 %v1321_v26 }
  0xa8   :  { %832 = vmatprep.subr.bf16.mxu0 %v1326_v27 }
  0xab   :  { %833 = vmatpush2.bf16.msra.mxu0 %v1324_v28 }
  0xac   :  { %834 = vmatprep.subr.bf16.mxu0 %v1329_v29 }
  0xaf   :  { %835 = vmatpush2.bf16.msra.mxu0 %v1327_v30 }
  0xb0   :  { %836 = vmatprep.subr.bf16.mxu0 %v1332_v50 }
  0xb3   :  { %837 = vmatpush2.bf16.msra.mxu0 %v1330_v51 }
  0xb4   :  { %838 = vmatprep.subr.bf16.mxu0 %v1335_v52 }
  0xb7   :  { %839 = vmatpush2.bf16.msra.mxu0 %v1333_v53 }
  0xb8   :  { %840 = vmatprep.subr.bf16.mxu0 %v1338_v55 }
  0xbb   :  { %841 = vmatpush2.bf16.msra.mxu0 %v1336_v56 }
 0x13e   :  { %v342_v38 = vpop.f32.mrf.mxu0 }
 0x13f   :  { %v343_v39 = vadd.f32 %v342_v38, %v141_v36 }
 0x140   :  { %v344_v40 = vpop.f32.mrf.mxu0 }
 0x141   :  { %v349_v41 = vmax.f32 %v343_v39, 0.0  ;;  %v345_v42 = vadd.f32 %v344_v40, %v145_v37 }
 0x142   :  { %v346_v43 = vpop.f32.mrf.mxu0 }
 0x143   :  { %v350_v44 = vmax.f32 %v345_v42, 0.0  ;;  %v351_v45 = vadd.f32 %v349_v41, %v1571_v54  ;;  %v1339_v54 = vld [vmem:[#allocation10 + $0x78] sm:$0xff]  }
 0x144   :  { %v347_v46 = vpop.f32.mrf.mxu0  ;;  %1163 = vmatprep.subr.bf16.mxu1 %v1339_v54 }
 0x145   :  { %v352_v47 = vadd.f32 %v350_v44, %v1567_v14  ;;  %v353_v49 = vpack.c.bf16 %v351_v45, %v351_v45  ;;  %v1342_v14 = vld [vmem:[#allocation10 + $0x30] sm:$0xff]  }
 0x147   :  { %v354_v48 = vpack.c.bf16 %v352_v47, %v352_v47 }
 0x149   :  { %591 = vmatprep.mubr.bf16.mxu1 %v354_v48 }
 0x14a   :  { %592 = vmatmul.mubr.bf16.vlgmr.msra.gmra.mxu1 %v353_v49 }
 0x14b   :  { %1164 = vmatpush3.bf16.msra.mxu1 %v1340_v57 }
 0x14c   :  { %1165 = vmatprep.subr.bf16.mxu1 %v1341_v58 }
 0x14f   :  { %1166 = vmatpush3.bf16.msra.mxu1 %v1342_v14 }
 0x150   :  { %1167 = vmatprep.subr.bf16.mxu1 %v1343_v59 }
 0x153   :  { %1168 = vmatpush3.bf16.msra.mxu1 %v1344_v60 }
 0x154   :  { %1169 = vmatprep.subr.bf16.mxu1 %v1345_v61 }
 0x157   :  { %1170 = vmatpush3.bf16.msra.mxu1 %v1346_v62 }
 0x158   :  { %1171 = vmatprep.subr.bf16.mxu1 %v1347_v63 }
 0x15b   :  { %1172 = vmatpush3.bf16.msra.mxu1 %v1348_v0 }
 0x15c   :  { %1173 = vmatprep.subr.bf16.mxu1 %v1349_v17 }
 0x15f   :  { %1174 = vmatpush3.bf16.msra.mxu1 %v1350_v18 }
 0x160   :  { %1175 = vmatprep.subr.bf16.mxu1 %v1351_v19 }
 0x163   :  { %1176 = vmatpush3.bf16.msra.mxu1 %v1352_v20 }
 0x164   :  { %1177 = vmatprep.subr.bf16.mxu1 %v1353_v21 }
 0x167   :  { %1178 = vmatpush3.bf16.msra.mxu1 %v1354_v22 }
 0x20a   :  { %v593_v4 = vpop.f32.mrf.mxu1 }
 0x20b   :  { %v594_v5 = vadd.f32 %v593_v4, %v392_v2 }
 0x20c   :  { %v595_v6 = vpop.f32.mrf.mxu1 }
 0x20d   :  { %v600_v7 = vmax.f32 %v594_v5, 0.0  ;;  %v596_v8 = vadd.f32 %v595_v6, %v396_v3 }
 0x20e   :  { %v597_v9 = vpop.f32.mrf.mxu1 }
 0x20f   :  { %v601_v10 = vmax.f32 %v596_v8, 0.0  ;;  %v602_v11 = vadd.f32 %v600_v7, %v351_v45 }
 0x210   :  { %v598_v12 = vpop.f32.mrf.mxu1 }
 0x211   :  { %v603_v13 = vadd.f32 %v601_v10, %v352_v47  ;;  %v604_v16 = vpack.c.bf16 %v602_v11, %v602_v11 }
 0x213   :  { %v605_v15 = vpack.c.bf16 %v603_v13, %v603_v13 }
 0x215   :  { %842 = vmatprep.mubr.bf16.mxu0 %v605_v15 }
 0x216   :  { %843 = vmatmul.mubr.bf16.vlgmr.msra.gmra.mxu0 %v604_v16 }
 0x2d6   :  { %v844_v26 = vpop.f32.mrf.mxu0 }
 0x2d7   :  { %v845_v27 = vadd.f32 %v844_v26, %v643_v24 }
 0x2d8   :  { %v846_v28 = vpop.f32.mrf.mxu0 }
 0x2d9   :  { %v851_v29 = vmax.f32 %v845_v27, 0.0  ;;  %v847_v30 = vadd.f32 %v846_v28, %v647_v25 }
 0x2da   :  { %v848_v31 = vpop.f32.mrf.mxu0 }
 0x2db   :  { %v852_v32 = vmax.f32 %v847_v30, 0.0  ;;  %v853_v34 = vadd.f32 %v851_v29, %v602_v11 }
 0x2dc   :  { %v849_v36 = vpop.f32.mrf.mxu0 }
 0x2dd   :  { %v854_v37 = vadd.f32 %v852_v32, %v603_v13  ;;  %v855_v39 = vpack.c.bf16 %v853_v34, %v853_v34 }
 0x2df   :  { %v856_v38 = vpack.c.bf16 %v854_v37, %v854_v37 }
 0x2e1   :  { %1024 = vmatprep.mubr.bf16.mxu1 %v856_v38 }
 0x2e2   :  { %1025 = vmatmul.mubr.bf16.vlgmr.msra.gmra.mxu1 %v855_v39 }
 0x3a2   :  { %v1179_v40 = vpop.f32.mrf.mxu1 }
 0x3a4   :  { %v1180_v35 = vpop.f32.mrf.mxu1 }
 0x3a5   :  { %v1181_v41 = vadd.f32 %v1180_v35, %v1179_v40 }
 0x3a6   :  { %v1182_v42 = vpop.f32.mrf.mxu1 }
 0x3a7   :  { %v1027_v43 = vadd.f32 %v1181_v41, %v1146_v33 }
 0x3a8   :  { %v1183_v44 = vpop.f32.mrf.mxu1 }
 0x3a9   :  { %1032 = vst [vmem:[#allocation11] sm:$0xff] %v1027_v43 }
 0x3aa   :  { %1466 = shalt.err (!%p1463_p1)
}
 0x3ab   :  { %1042 = dma.vmem_to_hbm [thread:$0]  %s1040_s18, 128, %s1611_s9, [#allocation4]  }
 0x3ac   :  { %1481 = dma.done.wait [#allocation4], 128  }
 0x3ad   :  { %1482 = vsyncadd [#allocation4], 4294967168 }
 0x3ae   :  { %1046 = vsyncpa [#allocation3], 1 }
 0x3af   :  { %1047 = vsyncpa [#allocation6], 1 }
 0x3b0   :  { %1048 = vsyncpa [#allocation9], 1 }
 0x3b1   :  { %1049 = vsyncpa [#allocation4], 1 }

</bundles_post_ra>
